<compile_context>
chip_gen: v7x
topology: tpu7x:2x2x1
jax: 0.10.0
libtpu: 0.0.40
codegen_flags: <defaults>
</compile_context>

<pallas_src>
import functools

import jax
import jax.numpy as jnp
from jax.experimental import pallas as pl
from jax.experimental.pallas import tpu as pltpu


def _round_up(v, m):
    return -(-v // m) * m


def _club_kernel(
    x_ref, y_ref, ystats_ref,          # streamed tiles + y moments
    w1_ref, b1_ref, w2_ref, b2_ref,    # packed params (resident across grid)
    out_ref,                           # (1, 8, 128) per-tile partial-sum block
    *, y_dim, n_valid, tile_n, masked,
):
    # Streamed data may be bf16 on the wire; all math is f32.
    x = x_ref[...].astype(jnp.float32)            # [tile_n, x_dim]
    y = y_ref[...].astype(jnp.float32)            # [tile_n, y_dim]

    # ---- fused first layer for both heads: [tile_n, x_dim] @ [x_dim, 2*h2] ----
    h = jnp.dot(x, w1_ref[...], preferred_element_type=jnp.float32) + b1_ref[...]
    h = jnp.maximum(h, 0.0)

    # ---- single fused second-layer matmul; W2 is block-diagonal so the two
    #      heads are the first / second y_dim column groups of z2. ----
    z2 = jnp.dot(h, w2_ref[...], preferred_element_type=jnp.float32) + b2_ref[...]
    mu = z2[:, :y_dim]
    logvar = jnp.tanh(z2[:, y_dim:])
    inv_var = jnp.exp(-logvar)                    # 1 / exp(logvar)  (EUP)

    ey = ystats_ref[0:1, :]                       # E_j[y]      [1, y_dim]
    var_y = ystats_ref[1:2, :]                    # Var_j[y]    [1, y_dim]

    # positive - negative = 0.5 * inv_var * ((mu - E[y])^2 + Var[y] - (mu - y)^2)
    d_pos = mu - y
    d_neg = mu - ey
    contrib = 0.5 * inv_var * (d_neg * d_neg + var_y - d_pos * d_pos)

    if masked:
        rows = (pl.program_id(0) * tile_n
                + jax.lax.broadcasted_iota(jnp.int32, (tile_n, 1), 0))
        contrib = jnp.where(rows < n_valid, contrib, 0.0)

    # Per-tile partial sum, broadcast into a lane-dense output block.
    out_ref[...] = jnp.full(out_ref.shape, jnp.sum(contrib), dtype=out_ref.dtype)


def _pick_tile_n(n, row_bytes, target_bytes=1 << 20, max_rows=32768):
    """Row tile sized by streamed bytes per grid step (multiple of 8)."""
    n8 = _round_up(n, 8)
    t = max(8, min(max_rows, target_bytes // max(row_bytes, 1)))
    t = (t // 8) * 8
    return n8 if t >= n8 else t


def pack_club_params(params):
    """Pack the 8 CLUB parameter tensors into 4 arrays. Call once per update."""
    w1m, b1m, w2m, b2m, w1v, b1v, w2v, b2v = params
    f32 = jnp.float32
    h2 = w1m.shape[1]
    y_dim = w2m.shape[1]
    w1 = jnp.concatenate([w1m, w1v], axis=1).astype(f32)          # [x_dim, 2*h2]
    b1 = jnp.concatenate([b1m, b1v], axis=1).astype(f32)          # [1, 2*h2]
    w2 = (jnp.zeros((2 * h2, 2 * y_dim), f32)
          .at[:h2, :y_dim].set(w2m.astype(f32))
          .at[h2:, y_dim:].set(w2v.astype(f32)))                  # block-diagonal
    b2 = jnp.concatenate([b2m, b2v], axis=1).astype(f32)          # [1, 2*y_dim]
    return (w1, b1, w2, b2)


def club_forward(x, y, packed_params, *, tile_n=None,
                 stream_dtype=jnp.float32, y_stats=None):
    """CLUB forward (mutual-information upper bound estimate) via Pallas."""
    w1, b1, w2, b2 = packed_params
    n, x_dim = x.shape
    y_dim = w2.shape[1] // 2
    h2_tot = w1.shape[1]                                          # = 2 * h2
    f32 = jnp.float32

    # ---- y moments for the negative term (O(N*y_dim), f32, computed from the
    #      un-quantized y).  Pass y_stats= to skip this extra pass over y. ----
    if y_stats is None:
        y32 = y.astype(f32)
        ey = jnp.mean(y32, axis=0, keepdims=True)
        var_y = jnp.maximum(jnp.mean(y32 * y32, axis=0, keepdims=True) - ey * ey, 0.0)
        y_stats = jnp.concatenate([ey, var_y], axis=0)            # [2, y_dim]
    y_stats = y_stats.astype(f32)

    # ---- streaming dtype (bf16 halves HBM bytes; math stays f32 in-kernel) ----
    x_s = x.astype(stream_dtype)
    y_s = y.astype(stream_dtype)
    itemsize = jnp.dtype(stream_dtype).itemsize
    row_bytes = (x_dim + y_dim) * itemsize

    # ---- tile choice + pad-to-tile (masked in-kernel) ----
    if tile_n is None:
        tile_n = _pick_tile_n(n, row_bytes)
    tile_n = max(8, _round_up(int(tile_n), 8))
    padded_n = _round_up(n, tile_n)
    masked = padded_n != n
    if masked:
        pad = padded_n - n
        x_s = jnp.pad(x_s, ((0, pad), (0, 0)))
        y_s = jnp.pad(y_s, ((0, pad), (0, 0)))
    num_tiles = padded_n // tile_n

    # ---- VMEM budget: 2 stream buffers + resident params + f32 intermediates ----
    stream_bytes = tile_n * (x_dim + y_dim) * itemsize
    param_bytes = 4 * (w1.size + b1.size + w2.size + b2.size + y_stats.size)
    inter_bytes = 4 * tile_n * (x_dim + y_dim + 2 * h2_tot + 8 * y_dim)
    vmem_est = 2 * stream_bytes + 2 * param_bytes + 2 * inter_bytes + (4 << 20)
    vmem_limit = int(min(64 << 20, max(32 << 20, vmem_est)))

    kernel = functools.partial(
        _club_kernel, y_dim=y_dim, n_valid=n, tile_n=tile_n, masked=masked)

    out = pl.pallas_call(
        kernel,
        out_shape=jax.ShapeDtypeStruct((num_tiles, 8, 128), jnp.float32),
        grid=(num_tiles,),
        in_specs=[
            pl.BlockSpec((tile_n, x_dim), lambda i: (i, 0)),       # x tile
            pl.BlockSpec((tile_n, y_dim), lambda i: (i, 0)),       # y tile
            pl.BlockSpec((2, y_dim), lambda i: (0, 0)),            # y moments
            pl.BlockSpec(w1.shape, lambda i: (0, 0)),              # W1 (resident)
            pl.BlockSpec(b1.shape, lambda i: (0, 0)),              # b1
            pl.BlockSpec(w2.shape, lambda i: (0, 0)),              # W2 (block-diag)
            pl.BlockSpec(b2.shape, lambda i: (0, 0)),              # b2
        ],
        out_specs=pl.BlockSpec((1, 8, 128), lambda i: (i, 0, 0)),  # per-tile partial
        compiler_params=pltpu.CompilerParams(
            dimension_semantics=("parallel",),
            vmem_limit_bytes=vmem_limit,
        ),
    )(x_s, y_s, y_stats, w1, b1, w2, b2)

    # Final reduction across tiles + mean over N done in the wrapper.
    return jnp.sum(out[:, 0, 0]) * (1.0 / float(n))


def init_params(key, x_dim, y_dim, hidden_size):
    """Deterministic synthetic init. Weights stored as [in_dim, out_dim]."""
    h2 = hidden_size // 2
    ks = jax.random.split(key, 8)
    scale = 0.1
    w1m = scale * jax.random.normal(ks[0], (x_dim, h2), jnp.float32)
    b1m = scale * jax.random.normal(ks[1], (1, h2), jnp.float32)
    w2m = scale * jax.random.normal(ks[2], (h2, y_dim), jnp.float32)
    b2m = scale * jax.random.normal(ks[3], (1, y_dim), jnp.float32)
    w1v = scale * jax.random.normal(ks[4], (x_dim, h2), jnp.float32)
    b1v = scale * jax.random.normal(ks[5], (1, h2), jnp.float32)
    w2v = scale * jax.random.normal(ks[6], (h2, y_dim), jnp.float32)
    b2v = scale * jax.random.normal(ks[7], (1, y_dim), jnp.float32)
    return (w1m, b1m, w2m, b2m, w1v, b1v, w2v, b2v)


def reference_forward(x, y, params):
    """Pure-JAX reference mirroring the PyTorch forward exactly (O(N^2) form)."""
    (w1m, b1m, w2m, b2m, w1v, b1v, w2v, b2v) = params
    mu = jnp.maximum(x @ w1m + b1m, 0.0) @ w2m + b2m
    logvar = jnp.tanh(jnp.maximum(x @ w1v + b1v, 0.0) @ w2v + b2v)
    positive = -((mu - y) ** 2) / 2.0 / jnp.exp(logvar)
    diff = y[None, :, :] - mu[:, None, :]
    negative = -jnp.mean(diff ** 2, axis=1) / 2.0 / jnp.exp(logvar)
    return jnp.mean(jnp.sum(positive, axis=-1) - jnp.sum(negative, axis=-1))


if __name__ == "__main__":
    # Small shapes consistent with the module: samples [N, x_dim]/[N, y_dim].
    N, x_dim, y_dim, hidden_size = 64, 16, 16, 32

    key = jax.random.PRNGKey(0)
    kx, ky, kp = jax.random.split(key, 3)
    x = jax.random.normal(kx, (N, x_dim), jnp.float32)
    y = jax.random.normal(ky, (N, y_dim), jnp.float32)
    params = init_params(kp, x_dim, y_dim, hidden_size)
    packed = pack_club_params(params)   # packed once, reused across calls

    ref = reference_forward(x, y, params)

    # 1) Default path: one big tile covering the whole (small) batch.
    out1 = jax.block_until_ready(club_forward(x, y, packed))
    # 2) Multi-tile path (grid of 4, "parallel" axis, per-tile partial sums).
    out2 = jax.block_until_ready(club_forward(x, y, packed, tile_n=16))
    # 3) Awkward N: exercises the pad-to-tile + in-kernel row-mask path.
    x50, y50 = x[:50], y[:50]
    ref50 = reference_forward(x50, y50, params)
    out3 = jax.block_until_ready(club_forward(x50, y50, packed, tile_n=16))
    # 4) bf16 streaming mode (HBM bytes halved; math stays f32 in-kernel).
    out4 = jax.block_until_ready(
        club_forward(x, y, packed, stream_dtype=jnp.bfloat16))

    assert jnp.allclose(out1, ref, atol=1e-4, rtol=1e-4), (out1, ref)
    assert jnp.allclose(out2, ref, atol=1e-4, rtol=1e-4), (out2, ref)
    assert jnp.allclose(out3, ref50, atol=1e-4, rtol=1e-4), (out3, ref50)
    assert jnp.allclose(out4, ref, atol=5e-2, rtol=0.0), (out4, ref)

    print("KERNEL_OK")
</pallas_src>

<mosaic_0001>
module attributes {stable_mosaic.version = 11 : i64} {
  func.func @_club_kernel(%arg0: i32, %arg1: memref<64x16xf32, #tpu.memory_space<vmem>>, %arg2: memref<64x16xf32, #tpu.memory_space<vmem>>, %arg3: memref<2x16xf32, #tpu.memory_space<vmem>>, %arg4: memref<16x32xf32, #tpu.memory_space<vmem>>, %arg5: memref<1x32xf32, #tpu.memory_space<vmem>>, %arg6: memref<32x32xf32, #tpu.memory_space<vmem>>, %arg7: memref<1x32xf32, #tpu.memory_space<vmem>>, %arg8: memref<1x8x128xf32, #tpu.memory_space<vmem>>) attributes {dimension_semantics = [#tpu.dimension_semantics<parallel>], iteration_bounds = array<i64: 1>, scalar_prefetch = 0 : i64, scratch_operands = 0 : i64, tpu.core_type = #tpu.core_type<tc>, window_params = [{transform_indices = @transform_0, window_bounds = array<i64: 64, 16>}, {transform_indices = @transform_1, window_bounds = array<i64: 64, 16>}, {pipeline_mode = #tpu.pipeline_mode<synchronous>, transform_indices = @transform_2, window_bounds = array<i64: 2, 16>}, {pipeline_mode = #tpu.pipeline_mode<synchronous>, transform_indices = @transform_3, window_bounds = array<i64: 16, 32>}, {pipeline_mode = #tpu.pipeline_mode<synchronous>, transform_indices = @transform_4, window_bounds = array<i64: 1, 32>}, {pipeline_mode = #tpu.pipeline_mode<synchronous>, transform_indices = @transform_5, window_bounds = array<i64: 32, 32>}, {pipeline_mode = #tpu.pipeline_mode<synchronous>, transform_indices = @transform_6, window_bounds = array<i64: 1, 32>}, {transform_indices = @transform_7, window_bounds = array<i64: 1, 8, 128>}]} {
    %c0 = arith.constant 0 : index
    %c0_0 = arith.constant 0 : index
    %0 = vector.load %arg1[%c0, %c0_0] : memref<64x16xf32, #tpu.memory_space<vmem>>, vector<64x16xf32>
    %c0_1 = arith.constant 0 : index
    %c0_2 = arith.constant 0 : index
    %1 = vector.load %arg2[%c0_1, %c0_2] : memref<64x16xf32, #tpu.memory_space<vmem>>, vector<64x16xf32>
    %c0_3 = arith.constant 0 : index
    %c0_4 = arith.constant 0 : index
    %2 = vector.load %arg4[%c0_3, %c0_4] : memref<16x32xf32, #tpu.memory_space<vmem>>, vector<16x32xf32>
    %cst = arith.constant dense<0.000000e+00> : vector<64x32xf32>
    %3 = tpu.matmul %0, %2, %cst {dimension_numbers = #tpu.dot_dimension_numbers<[1], [0], [0], [1], [0, 0, 1, 1], [], []>} : vector<64x16xf32>, vector<16x32xf32>, vector<64x32xf32> -> vector<64x32xf32>
    %c0_5 = arith.constant 0 : index
    %c0_6 = arith.constant 0 : index
    %4 = vector.load %arg5[%c0_5, %c0_6] : memref<1x32xf32, #tpu.memory_space<vmem>>, vector<1x32xf32>
    %5 = vector.broadcast %4 : vector<1x32xf32> to vector<64x32xf32>
    %6 = arith.addf %3, %5 : vector<64x32xf32>
    %cst_7 = arith.constant 0.000000e+00 : f32
    %7 = vector.broadcast %cst_7 : f32 to vector<64x32xf32>
    %8 = arith.maximumf %6, %7 : vector<64x32xf32>
    %c0_8 = arith.constant 0 : index
    %c0_9 = arith.constant 0 : index
    %9 = vector.load %arg6[%c0_8, %c0_9] : memref<32x32xf32, #tpu.memory_space<vmem>>, vector<32x32xf32>
    %cst_10 = arith.constant dense<0.000000e+00> : vector<64x32xf32>
    %10 = tpu.matmul %8, %9, %cst_10 {dimension_numbers = #tpu.dot_dimension_numbers<[1], [0], [0], [1], [0, 0, 1, 1], [], []>} : vector<64x32xf32>, vector<32x32xf32>, vector<64x32xf32> -> vector<64x32xf32>
    %c0_11 = arith.constant 0 : index
    %c0_12 = arith.constant 0 : index
    %11 = vector.load %arg7[%c0_11, %c0_12] : memref<1x32xf32, #tpu.memory_space<vmem>>, vector<1x32xf32>
    %12 = vector.broadcast %11 : vector<1x32xf32> to vector<64x32xf32>
    %13 = arith.addf %10, %12 : vector<64x32xf32>
    %14 = vector.extract_strided_slice %13 {offsets = [0, 0], sizes = [64, 16], strides = [1, 1]} : vector<64x32xf32> to vector<64x16xf32>
    %15 = vector.extract_strided_slice %13 {offsets = [0, 16], sizes = [64, 16], strides = [1, 1]} : vector<64x32xf32> to vector<64x16xf32>
    %16 = math.tanh %15 : vector<64x16xf32>
    %cst_13 = arith.constant 0.000000e+00 : f32
    %17 = vector.broadcast %cst_13 : f32 to vector<64x16xf32>
    %18 = arith.subf %17, %16 : vector<64x16xf32>
    %19 = math.exp %18 : vector<64x16xf32>
    %c0_14 = arith.constant 0 : index
    %c0_15 = arith.constant 0 : index
    %20 = vector.load %arg3[%c0_14, %c0_15] : memref<2x16xf32, #tpu.memory_space<vmem>>, vector<1x16xf32>
    %c1 = arith.constant 1 : index
    %c0_16 = arith.constant 0 : index
    %21 = vector.load %arg3[%c1, %c0_16] : memref<2x16xf32, #tpu.memory_space<vmem>>, vector<1x16xf32>
    %22 = arith.subf %14, %1 : vector<64x16xf32>
    %23 = vector.broadcast %20 : vector<1x16xf32> to vector<64x16xf32>
    %24 = arith.subf %14, %23 : vector<64x16xf32>
    %cst_17 = arith.constant 5.000000e-01 : f32
    %25 = vector.broadcast %cst_17 : f32 to vector<64x16xf32>
    %26 = arith.mulf %25, %19 : vector<64x16xf32>
    %27 = arith.mulf %24, %24 : vector<64x16xf32>
    %28 = vector.broadcast %21 : vector<1x16xf32> to vector<64x16xf32>
    %29 = arith.addf %27, %28 : vector<64x16xf32>
    %30 = arith.mulf %22, %22 : vector<64x16xf32>
    %31 = arith.subf %29, %30 : vector<64x16xf32>
    %32 = arith.mulf %26, %31 : vector<64x16xf32>
    %33 = vector.shape_cast %32 : vector<64x16xf32> to vector<1x64x16xf32>
    %cst_18 = arith.constant dense<0.000000e+00> : vector<1xf32>
    %34 = vector.multi_reduction <add>, %33, %cst_18 [1, 2] : vector<1x64x16xf32> to vector<1xf32>
    %35 = vector.shape_cast %34 : vector<1xf32> to vector<1x1x1xf32>
    %36 = vector.extract %35[0, 0, 0] : f32 from vector<1x1x1xf32>
    %37 = vector.broadcast %36 : f32 to vector<1x8x128xf32>
    %c0_19 = arith.constant 0 : index
    %c0_20 = arith.constant 0 : index
    %c0_21 = arith.constant 0 : index
    %38 = vector.load %arg8[%c0_19, %c0_20, %c0_21] : memref<1x8x128xf32, #tpu.memory_space<vmem>>, vector<1x8x128xf32>
    tpu.vector_store %arg8[%c0_19, %c0_20, %c0_21], %37 {strides = array<i32>} : memref<1x8x128xf32, #tpu.memory_space<vmem>>, vector<1x8x128xf32>,
    return
  }
  func.func @transform_0(%arg0: i32) -> (i32, i32) {
    %c0_i32 = arith.constant 0 : i32
    %c0_i32_0 = arith.constant 0 : i32
    return %arg0, %c0_i32 : i32, i32
  }
  func.func @transform_1(%arg0: i32) -> (i32, i32) {
    %c0_i32 = arith.constant 0 : i32
    %c0_i32_0 = arith.constant 0 : i32
    return %arg0, %c0_i32 : i32, i32
  }
  func.func @transform_2(%arg0: i32) -> (i32, i32) {
    %c0_i32 = arith.constant 0 : i32
    %c0_i32_0 = arith.constant 0 : i32
    %c0_i32_1 = arith.constant 0 : i32
    return %c0_i32, %c0_i32_0 : i32, i32
  }
  func.func @transform_3(%arg0: i32) -> (i32, i32) {
    %c0_i32 = arith.constant 0 : i32
    %c0_i32_0 = arith.constant 0 : i32
    %c0_i32_1 = arith.constant 0 : i32
    return %c0_i32, %c0_i32_0 : i32, i32
  }
  func.func @transform_4(%arg0: i32) -> (i32, i32) {
    %c0_i32 = arith.constant 0 : i32
    %c0_i32_0 = arith.constant 0 : i32
    %c0_i32_1 = arith.constant 0 : i32
    return %c0_i32, %c0_i32_0 : i32, i32
  }
  func.func @transform_5(%arg0: i32) -> (i32, i32) {
    %c0_i32 = arith.constant 0 : i32
    %c0_i32_0 = arith.constant 0 : i32
    %c0_i32_1 = arith.constant 0 : i32
    return %c0_i32, %c0_i32_0 : i32, i32
  }
  func.func @transform_6(%arg0: i32) -> (i32, i32) {
    %c0_i32 = arith.constant 0 : i32
    %c0_i32_0 = arith.constant 0 : i32
    %c0_i32_1 = arith.constant 0 : i32
    return %c0_i32, %c0_i32_0 : i32, i32
  }
  func.func @transform_7(%arg0: i32) -> (i32, i32, i32) {
    %c0_i32 = arith.constant 0 : i32
    %c0_i32_0 = arith.constant 0 : i32
    %c0_i32_1 = arith.constant 0 : i32
    return %arg0, %c0_i32, %c0_i32_0 : i32, i32, i32
  }
}

</mosaic_0001>

<bundles_post_ra>
// kernel: tpu_custom_call.1
= control target key start
LH: loop header
LB: loop body
LE: loop exit
PB: predicated region body
PF: predicated region fallthrough
CT: control target
= control target key end

     0   :  { %vm52_vm0 = vcmask 130048   ;;  %s895_s0 = inlined_call_operand.vmem [shape: f32[64,16], index: 0, kind: input, shape index: {}]   ;;  %s896_s1 = inlined_call_operand.vmem [shape: f32[64,16], index: 1, kind: input, shape index: {}]   ;;  %s897_s2 = inlined_call_operand.vmem [shape: f32[2,16], index: 2, kind: input, shape index: {}]   ;;  %s898_s3 = inlined_call_operand.vmem [shape: f32[16,32], index: 3, kind: input, shape index: {}]   ;;  %s899_s4 = inlined_call_operand.vmem [shape: f32[1,32], index: 4, kind: input, shape index: {}]   ;;  %s900_s5 = inlined_call_operand.vmem [shape: f32[32,32], index: 5, kind: input, shape index: {}]   ;;  %s901_s6 = inlined_call_operand.vmem [shape: f32[1,32], index: 6, kind: input, shape index: {}]   ;;  %s902_s7 = inlined_call_operand.hbm [shape: f32[1,8,128], index: 7, kind: output, shape index: {}]  }
   0x1   :  { %v43_v0 = vld [vmem:[%s898_s3] sm:$0xff]  ;;  %v44_v1 = vld [vmem:[%s898_s3 + $0x8] sm:$0xff] }
   0x2   :  { %v27_v2 = vld [vmem:[%s895_s0] sm:$0xff]  ;;  %v619_v3 = vpack.c.bf16 %v44_v1, %v43_v0  ;;  %v191_v5 = vld [vmem:[%s900_s5 + $0x8] sm:$0xff] }
   0x3   :  { %587 = vmatprep.mubr.msk.f32.mxu0 %vm52_vm0, %v27_v2  ;;  %v190_v4 = vld [vmem:[%s900_s5] sm:$0xff]  ;;  %v28_v6 = vld [vmem:[%s895_s0 + $0x8] sm:$0xff] }
   0x4   :  { %620 = vmatprep.subr.bf16.mxu0 %v619_v3  ;;  %v623_v7 = vpack.c.bf16 %v191_v5, %v190_v4 }
   0x5   :  { %622 = vmatpush3.bf16.msra.mxu0 %v619_v3 }
   0x6   :  { %12 = vsyncpa [#allocation3], 0  ;;  %v29_v8 = vld [vmem:[%s895_s0 + $0x10] sm:$0xff]  ;;  %624 = vmatprep.subr.bf16.mxu1 %v623_v7  ;;  %v30_v9 = vld [vmem:[%s895_s0 + $0x18] sm:$0xff]  ;;  %vm201_vm1 = vcmask 261120   ;;  %s692_s19 = smov 16  }
   0x7   :  { %626 = vmatpush3.bf16.msra.mxu1 %v623_v7  ;;  %v31_v10 = vld [vmem:[%s895_s0 + $0x20] sm:$0xff]  ;;  %v32_v11 = vld [vmem:[%s895_s0 + $0x28] sm:$0xff]  ;;  %v33_v12 = vld [vmem:[%s895_s0 + $0x30] sm:$0xff]  ;;  %s694_s24 = smov [#allocation2]  }
   0x8   :  { %588 = vmatmul.mubr.msk.f32.vlgmr.msra.gmra.mrb[0].mxu0 %vm52_vm0, %v28_v6  ;;  %v34_v13 = vld [vmem:[%s895_s0 + $0x38] sm:$0xff]  ;;  %v192_v14 = vld [vmem:[%s900_s5 + $0x10] sm:$0xff]  ;;  %v541_v17 = vld [vmem:[%s899_s4] ss:$0 sm:$0xff]  ;;  %s533_s25 = sshll.u32 %s694_s24, 4  ;;  %s534_s25 = int_to_ptr.vmem [resolvable:$true] %s533_s25 }
   0x9   :  { %590 = vmatprep.mubr.msk.f32.mxu0 %vm52_vm0, %v29_v8  ;;  %v193_v15 = vld [vmem:[%s900_s5 + $0x18] sm:$0xff]  ;;  %v550_v42 = vld [vmem:[%s901_s6] ss:$0 sm:$0xff]  ;;  %v36_v50 = vld [vmem:[%s896_s1 + $0x8] sm:$0xff]  ;;  %s668_s27 = scalar_lea.vmem %s534_s25, 128  ;;  %p673_p1 = scmp.lt.s32.totalorder %s534_s25, %s534_s25 }
   0xa   :  { %v627_v16 = vpack.c.bf16 %v193_v15, %v192_v14  ;;  %v559_v44 = vld [vmem:[%s897_s2] ss:$0 sm:$0xff]  ;;  %v820_v57 = vld [vmem:[%s897_s2 + $0x1] ss:$0 sm:$0xff]  ;;  %v37_v58 = vld [vmem:[%s896_s1 + $0x10] sm:$0xff]  ;;  %p669_p0 = scmp.ne.s32.totalorder %s534_s25, %s668_s27  ;;  %p674_p2 = scmp.lt.s32.totalorder %s668_s27, %s668_s27 }
   0xb   :  { %v35_v47 = vld [vmem:[%s896_s1] sm:$0xff]  ;;  %v38_v63 = vld [vmem:[%s896_s1 + $0x18] sm:$0xff] }
   0xc   :  { %591 = vmatmul.mubr.msk.f32.gmra.mrb[2].mxu0 %vm52_vm0, %v30_v9  ;;  %628 = vmatprep.subr.bf16.mxu1 %v627_v16  ;;  %v39_v7 = vld [vmem:[%s896_s1 + $0x20] sm:$0xff]  ;;  %p675_p3 = por %p674_p2, %p673_p1 }
   0xd   :  { %593 = vmatprep.mubr.msk.f32.mxu0 %vm52_vm0, %v31_v10  ;;  %630 = vmatpush3.bf16.msra.mxu1 %v627_v16  ;;  %v40_v16 = vld [vmem:[%s896_s1 + $0x28] sm:$0xff] }
   0xe   :  { %p676_p4 = pnand %p675_p3, %p669_p0 }
  0x10   :  { %594 = vmatmul.mubr.msk.f32.gmra.mrb[4].mxu0 %vm52_vm0, %v32_v11 }
  0x11   :  { %596 = vmatprep.mubr.msk.f32.mxu0 %vm52_vm0, %v33_v12 }
  0x14   :  { %597 = vmatmul.mubr.msk.f32.gmra.mrb[6].mxu0 %vm52_vm0, %v34_v13 }
  0xdb   :  { %v589_v18 = vpop.f32.mrb[0].mxu0 }
  0xdc   :  { %v149_v19 = vadd.f32 %v589_v18, %v541_v17  ;;  %v143_v20 = vpop.f32.mrb[1].mxu0 }
  0xdd   :  { %v144_v21 = vadd.f32 %v541_v17, %v143_v20 }
  0xde   :  { %v183_v24 = vmax.f32 %v149_v19, 0.0 }
  0xdf   :  { %v182_v22 = vmax.f32 %v144_v21, 0.0  ;;  %v592_v23 = vpop.f32.mrb[2].mxu0 }
  0xe0   :  { %v159_v25 = vadd.f32 %v592_v23, %v541_v17  ;;  %v153_v26 = vpop.f32.mrb[3].mxu0  ;;  %v41_v23 = vld [vmem:[%s896_s1 + $0x30] sm:$0xff] }
  0xe1   :  { %v154_v27 = vadd.f32 %v541_v17, %v153_v26  ;;  %607 = vmatprep.mubr.msk.f32.mxu1 %vm201_vm1, %v182_v22 }
  0xe2   :  { %608 = vmatmul.mubr.msk.f32.vlgmr.msra.gmra.mrb[0].mxu1 %vm201_vm1, %v183_v24  ;;  %v185_v30 = vmax.f32 %v159_v25, 0.0 }
  0xe3   :  { %v184_v28 = vmax.f32 %v154_v27, 0.0  ;;  %v595_v29 = vpop.f32.mrb[4].mxu0 }
  0xe4   :  { %v169_v31 = vadd.f32 %v595_v29, %v541_v17  ;;  %v163_v32 = vpop.f32.mrb[5].mxu0 }
  0xe5   :  { %v164_v33 = vadd.f32 %v541_v17, %v163_v32  ;;  %610 = vmatprep.mubr.msk.f32.mxu1 %vm201_vm1, %v184_v28 }
  0xe6   :  { %v187_v34 = vmax.f32 %v169_v31, 0.0  ;;  %611 = vmatmul.mubr.msk.f32.gmra.mrb[2].mxu1 %vm201_vm1, %v185_v30 }
  0xe7   :  { %v186_v35 = vmax.f32 %v164_v33, 0.0  ;;  %v598_v36 = vpop.f32.mrb[6].mxu0 }
  0xe8   :  { %v179_v37 = vadd.f32 %v598_v36, %v541_v17  ;;  %v173_v38 = vpop.f32.mrb[7].mxu0 }
  0xe9   :  { %v174_v39 = vadd.f32 %v541_v17, %v173_v38  ;;  %613 = vmatprep.mubr.msk.f32.mxu1 %vm201_vm1, %v186_v35  ;;  %v42_v38 = vld [vmem:[%s896_s1 + $0x38] sm:$0xff]  ;;  %s693_s1 = smov 112  }
  0xea   :  { %v189_v40 = vmax.f32 %v179_v37, 0.0  ;;  %614 = vmatmul.mubr.msk.f32.gmra.mrb[4].mxu1 %vm201_vm1, %v187_v34 }
  0xeb   :  { %v188_v41 = vmax.f32 %v174_v39, 0.0 }
  0xed   :  { %616 = vmatprep.mubr.msk.f32.mxu1 %vm201_vm1, %v188_v41 }
  0xee   :  { %617 = vmatmul.mubr.msk.f32.gmra.mrb[6].mxu1 %vm201_vm1, %v189_v40 }
 0x1b5   :  { %v609_v43 = vpop.f32.mrb[0].mxu1 }
 0x1b6   :  { %v802_v45 = vadd.f32 %v609_v43, %v550_v42  ;;  %v292_v46 = vpop.f32.mrb[1].mxu1 }
 0x1b7   :  { %v807_v48 = vadd.f32 %v550_v42, %v292_v46 }
 0x1b8   :  { %v378_v49 = vsub.f32 %v802_v45, %v559_v44  ;;  %v366_v61 = vsub.f32 %v802_v45, %v36_v50 }
 0x1b9   :  { %v377_v51 = vsub.f32 %v807_v48, %v559_v44  ;;  %v612_v52 = vpop.f32.mrb[2].mxu1  ;;  %v365_v53 = vsub.f32 %v807_v48, %v35_v47  ;;  %636 = vtanh.f32 %v807_v48 }
 0x1ba   :  { %v394_v54 = vmul.f32 %v378_v49, %v378_v49  ;;  %v815_v55 = vadd.f32 %v612_v52, %v550_v42  ;;  %v302_v56 = vpop.f32.mrb[3].mxu1  ;;  %v414_v13 = vmul.f32 %v366_v61, %v366_v61  ;;  %638 = vtanh.f32 %v802_v45 }
 0x1bb   :  { %v825_v59 = vadd.f32 %v550_v42, %v302_v56  ;;  %v393_v60 = vmul.f32 %v377_v51, %v377_v51  ;;  %v413_v3 = vmul.f32 %v365_v53, %v365_v53 }
 0x1bc   :  { %v380_v62 = vsub.f32 %v815_v55, %v559_v44  ;;  %v406_v9 = vadd.f32 %v820_v57, %v394_v54  ;;  %v368_v14 = vsub.f32 %v815_v55, %v38_v63 }
 0x1bd   :  { %v379_v0 = vsub.f32 %v825_v59, %v559_v44  ;;  %v615_v1 = vpop.f32.mrb[4].mxu1  ;;  %v405_v2 = vadd.f32 %v820_v57, %v393_v60  ;;  %v367_v4 = vsub.f32 %v825_v59, %v37_v58  ;;  %640 = vtanh.f32 %v825_v59 }
 0x1be   :  { %v396_v5 = vmul.f32 %v380_v62, %v380_v62  ;;  %v318_v6 = vadd.f32 %v615_v1, %v550_v42  ;;  %v312_v8 = vpop.f32.mrb[5].mxu1  ;;  %v422_v25 = vsub.f32 %v406_v9, %v414_v13  ;;  %v416_v31 = vmul.f32 %v368_v14, %v368_v14 }
 0x1bf   :  { %v313_v10 = vadd.f32 %v550_v42, %v312_v8  ;;  %v421_v11 = vsub.f32 %v405_v2, %v413_v3  ;;  %v395_v12 = vmul.f32 %v379_v0, %v379_v0  ;;  %v415_v21 = vmul.f32 %v367_v4, %v367_v4 }
 0x1c0   :  { %v382_v15 = vsub.f32 %v318_v6, %v559_v44  ;;  %v408_v26 = vadd.f32 %v820_v57, %v396_v5  ;;  %v370_v32 = vsub.f32 %v318_v6, %v40_v16  ;;  %642 = vtanh.f32 %v815_v55 }
 0x1c1   :  { %v369_v17 = vsub.f32 %v313_v10, %v39_v7  ;;  %v381_v18 = vsub.f32 %v313_v10, %v559_v44  ;;  %v618_v19 = vpop.f32.mrb[6].mxu1  ;;  %437 = vrot.lane.b32.xlu0 %v421_v11, %s692_s19  ;;  %v407_v20 = vadd.f32 %v820_v57, %v395_v12  ;;  %644 = vtanh.f32 %v313_v10 }
 0x1c2   :  { %v328_v22 = vadd.f32 %v618_v19, %v550_v42  ;;  %v322_v24 = vpop.f32.mrb[7].mxu1  ;;  %v398_v27 = vmul.f32 %v382_v15, %v382_v15  ;;  %v424_v39 = vsub.f32 %v408_v26, %v416_v31  ;;  %v418_v46 = vmul.f32 %v370_v32, %v370_v32 }
 0x1c3   :  { %v397_v28 = vmul.f32 %v381_v18, %v381_v18  ;;  %v323_v29 = vadd.f32 %v550_v42, %v322_v24  ;;  %v423_v30 = vsub.f32 %v407_v20, %v415_v21  ;;  %v417_v33 = vmul.f32 %v369_v17, %v369_v17  ;;  %v637_v56 = vpop.eup %636 }
 0x1c4   :  { %v384_v34 = vsub.f32 %v328_v22, %v559_v44  ;;  %v410_v43 = vadd.f32 %v820_v57, %v398_v27  ;;  %v372_v47 = vsub.f32 %v328_v22, %v42_v38  ;;  %646 = vtanh.f32 %v318_v6 }
 0x1c5   :  { %v371_v35 = vsub.f32 %v323_v29, %v41_v23  ;;  %v383_v36 = vsub.f32 %v323_v29, %v559_v44  ;;  %441 = vrot.lane.b32.xlu1 %v423_v30, %s692_s19  ;;  %439 = vrot.lane.b32.xlu0 %v422_v25, %s692_s19  ;;  %v409_v37 = vadd.f32 %v820_v57, %v397_v28  ;;  %648 = vtanh.f32 %v323_v29 }
 0x1c6   :  { %v400_v40 = vmul.f32 %v384_v34, %v384_v34  ;;  %v426_v50 = vsub.f32 %v410_v43, %v418_v46  ;;  %v420_v53 = vmul.f32 %v372_v47, %v372_v47  ;;  %v339_v58 = vsub.f32 0.0, %v637_v56 }
 0x1c7   :  { %v399_v41 = vmul.f32 %v383_v36, %v383_v36  ;;  %v425_v42 = vsub.f32 %v409_v37, %v417_v33  ;;  %v419_v49 = vmul.f32 %v371_v35, %v371_v35  ;;  %650 = vtanh.f32 %v328_v22 }
 0x1c8   :  { %v412_v52 = vadd.f32 %v820_v57, %v400_v40  ;;  %v347_v63 = vmul.f32 1.442695, %v339_v58 }
 0x1c9   :  { %443 = vrot.lane.b32.xlu1 %v424_v39, %s692_s19  ;;  %445 = vrot.lane.b32.xlu0 %v425_v42, %s692_s19  ;;  %v411_v44 = vadd.f32 %v820_v57, %v399_v41  ;;  %v639_v57 = vpop.eup %638 }
 0x1ca   :  { %v428_v54 = vsub.f32 %v412_v52, %v420_v53  ;;  %v641_v60 = vpop.eup %640  ;;  %v340_v61 = vsub.f32 0.0, %v639_v57  ;;  %652 = vpow2.f32 %v347_v63 }
 0x1cb   :  { %v427_v51 = vsub.f32 %v411_v44, %v419_v49  ;;  %v643_v62 = vpop.eup %642  ;;  %v341_v0 = vsub.f32 0.0, %v641_v60 }
 0x1cc   :  { %v645_v1 = vpop.eup %644  ;;  %v349_v48 = vmul.f32 1.442695, %v340_v61  ;;  %v342_v2 = vsub.f32 0.0, %v643_v62 }
 0x1cd   :  { %447 = vrot.lane.b32.xlu1 %v426_v50, %s692_s19  ;;  %449 = vrot.lane.b32.xlu0 %v427_v51, %s692_s19  ;;  %v351_v59 = vmul.f32 1.442695, %v341_v0  ;;  %v343_v3 = vsub.f32 0.0, %v645_v1 }
 0x1ce   :  { %v647_v45 = vpop.eup %646  ;;  %654 = vpow2.f32 %v349_v48  ;;  %v353_v4 = vmul.f32 1.442695, %v342_v2 }
 0x1cf   :  { %v649_v55 = vpop.eup %648  ;;  %v344_v5 = vsub.f32 0.0, %v647_v45  ;;  %656 = vpow2.f32 %v351_v59  ;;  %v355_v6 = vmul.f32 1.442695, %v343_v3 }
 0x1d0   :  { %v345_v7 = vsub.f32 0.0, %v649_v55  ;;  %658 = vpow2.f32 %v353_v4 }
 0x1d1   :  { %451 = vrot.lane.b32.xlu1 %v428_v54, %s692_s19  ;;  %v651_v8 = vpop.eup %650  ;;  %v357_v9 = vmul.f32 1.442695, %v344_v5  ;;  %660 = vpow2.f32 %v355_v6 }
 0x1d2   :  { %v359_v10 = vmul.f32 1.442695, %v345_v7  ;;  %v346_v11 = vsub.f32 0.0, %v651_v8 }
 0x1d3   :  { %662 = vpow2.f32 %v357_v9 }
 0x1d4   :  { %v653_v12 = vpop.eup %652  ;;  %664 = vpow2.f32 %v359_v10  ;;  %v361_v13 = vmul.f32 1.442695, %v346_v11 }
 0x1d5   :  { %v385_v15 = vmul.f32 0.5, %v653_v12 }
 0x1d6   :  { %666 = vpow2.f32 %v361_v13 }
 0x1d8   :  { %v655_v14 = vpop.eup %654 }
 0x1d9   :  { %v657_v16 = vpop.eup %656  ;;  %v386_v21 = vmul.f32 0.5, %v655_v14 }
 0x1da   :  { %v659_v19 = vpop.eup %658  ;;  %v387_v20 = vmul.f32 0.5, %v657_v16 }
 0x1db   :  { %v661_v22 = vpop.eup %660  ;;  %v388_v28 = vmul.f32 0.5, %v659_v19 }
 0x1dc   :  { %v389_v29 = vmul.f32 0.5, %v661_v22 }
 0x1dd   :  { %v663_v27 = vpop.eup %662 }
 0x1de   :  { %v665_v30 = vpop.eup %664  ;;  %v390_v35 = vmul.f32 0.5, %v663_v27 }
 0x1df   :  { %v391_v36 = vmul.f32 0.5, %v665_v30 }
 0x1e0   :  { %v667_v37 = vpop.eup %666 }
 0x1e1   :  { %v392_v42 = vmul.f32 0.5, %v667_v37 }
 0x233   :  { %v438_v17 = vpop.permute.xlu0 %437 }
 0x234   :  { %v461_v18 = vmul.f32 %v438_v17, %v385_v15 }
 0x236   :  { %477 = vrot.lane.b32.xlu0 %v461_v18, %s693_s1 }
 0x237   :  { %v442_v23 = vpop.permute.xlu1 %441  ;;  %v440_v24 = vpop.permute.xlu0 %439 }
 0x238   :  { %v463_v25 = vmul.f32 %v442_v23, %v387_v20  ;;  %v462_v26 = vmul.f32 %v440_v24, %v386_v21 }
 0x23a   :  { %479 = vrot.lane.b32.xlu1 %v462_v26, %s693_s1  ;;  %481 = vrot.lane.b32.xlu0 %v463_v25, %s693_s1 }
 0x23b   :  { %v444_v31 = vpop.permute.xlu1 %443  ;;  %v446_v32 = vpop.permute.xlu0 %445 }
 0x23c   :  { %v464_v33 = vmul.f32 %v444_v31, %v388_v28  ;;  %v465_v34 = vmul.f32 %v446_v32, %v389_v29 }
 0x23e   :  { %483 = vrot.lane.b32.xlu1 %v464_v33, %s693_s1  ;;  %485 = vrot.lane.b32.xlu0 %v465_v34, %s693_s1 }
 0x23f   :  { %v448_v38 = vpop.permute.xlu1 %447  ;;  %v450_v39 = vpop.permute.xlu0 %449 }
 0x240   :  { %v466_v40 = vmul.f32 %v448_v38, %v390_v35  ;;  %v467_v41 = vmul.f32 %v450_v39, %v391_v36 }
 0x242   :  { %487 = vrot.lane.b32.xlu1 %v466_v40, %s693_s1  ;;  %489 = vrot.lane.b32.xlu0 %v467_v41, %s693_s1 }
 0x243   :  { %v452_v43 = vpop.permute.xlu1 %451 }
 0x244   :  { %v468_v46 = vmul.f32 %v452_v43, %v392_v42 }
 0x246   :  { %491 = vrot.lane.b32.xlu1 %v468_v46, %s693_s1 }
 0x2a8   :  { %v478_v47 = vpop.permute.xlu0 %477 }
 0x2a9   :  { %v501_v50 = vsel %vm52_vm0, %v478_v47, 0.0 }
 0x2ac   :  { %v480_v49 = vpop.permute.xlu1 %479  ;;  %v482_v44 = vpop.permute.xlu0 %481 }
 0x2ad   :  { %v502_v51 = vsel %vm52_vm0, %v480_v49, 0.0  ;;  %v504_v53 = vsel %vm52_vm0, %v482_v44, 0.0 }
 0x2ae   :  { %v503_v52 = vadd.f32 %v502_v51, %v501_v50 }
 0x2b0   :  { %v505_v54 = vadd.f32 %v504_v53, %v503_v52  ;;  %v484_v56 = vpop.permute.xlu1 %483  ;;  %v486_v57 = vpop.permute.xlu0 %485 }
 0x2b1   :  { %v506_v58 = vsel %vm52_vm0, %v484_v56, 0.0  ;;  %v508_v61 = vsel %vm52_vm0, %v486_v57, 0.0 }
 0x2b2   :  { %v507_v60 = vadd.f32 %v506_v58, %v505_v54 }
 0x2b4   :  { %v509_v62 = vadd.f32 %v508_v61, %v507_v60  ;;  %v488_v63 = vpop.permute.xlu1 %487  ;;  %v490_v0 = vpop.permute.xlu0 %489 }
 0x2b5   :  { %v510_v1 = vsel %vm52_vm0, %v488_v63, 0.0  ;;  %v512_v2 = vsel %vm52_vm0, %v490_v0, 0.0 }
 0x2b6   :  { %v511_v48 = vadd.f32 %v510_v1, %v509_v62 }
 0x2b8   :  { %v513_v45 = vadd.f32 %v512_v2, %v511_v48  ;;  %v492_v59 = vpop.permute.xlu1 %491 }
 0x2b9   :  { %v514_v3 = vsel %vm52_vm0, %v492_v59, 0.0 }
 0x2ba   :  { %v515_v55 = vadd.f32 %v514_v3, %v513_v45 }
 0x2bc   :  { %516 = vadd.xlane.f32.xlu0 %v515_v55 }
 0x349   :  { %v517_v4 = vpop.xlane.xlu0 %516 }
 0x34a   :  { %v518_v5 = vrot.slane %v517_v4, 4 }
 0x34c   :  { %v519_v6 = vadd.f32 %v518_v5, %v517_v4 }
 0x34e   :  { %v520_v7 = vrot.slane %v519_v6, 2 }
 0x350   :  { %v521_v8 = vadd.f32 %v520_v7, %v519_v6 }
 0x352   :  { %v522_v9 = vrot.slane %v521_v8, 1 }
 0x354   :  { %v523_v10 = vadd.f32 %v522_v9, %v521_v8 }
 0x356   :  { %631 = vpush %v523_v10 }
 0x387   :  { %s632_s26 = spop %631 }
 0x388   :  { %v525_v11 = vstv %s632_s26 }
 0x389   :  { %526 = vst [vmem:[#allocation2] sm:$0xff] %v525_v11 }
 0x38a   :  { %679 = shalt.err (!%p676_p4)
}
 0x38b   :  { %s680_s0 = scalar_lea.hbm %s902_s7, 128 }
 0x38c   :  { %p681_p5 = scmp.ne.s32.totalorder %s902_s7, %s680_s0  ;;  %p684_p6 = scmp.lt.u32.totalorder %s680_s0, %s902_s7 }
 0x38e   :  { %p686_p7 = pnand %p684_p6, %p681_p5 }
 0x390   :  { %689 = shalt.err (!%p686_p7)
}
 0x391   :  { %536 = dma.vmem_to_hbm [thread:$0]  %s534_s25, 128, %s902_s7, [#allocation3]  }
 0x392   :  { %690 = dma.done.wait [#allocation3], 128  }
 0x393   :  { %691 = vsyncadd [#allocation3], 4294967168 }
 0x394   :  { %540 = vsyncpa [#allocation3], 1 }

</bundles_post_ra>
